<compile_context>
chip_gen: v7x
topology: tpu7x:2x2x1
jax: 0.10.0
libtpu: 0.0.40
codegen_flags: <defaults>
</compile_context>

<pallas_src>
import functools

import jax
import jax.numpy as jnp
from jax import lax
from jax.experimental import pallas as pl
from jax.experimental.pallas import tpu as pltpu


def _corr_kernel(inv_ref, a_ref, b_ref, o_ref, *, tm, hw, precision):
    # inv_ref: (hw, 1) int32, inv_ref[k,0] = output-row index i that reads A column k
    # a_ref:   (c, hw)  A, natural column order k = hi*w + wi (resident per batch)
    # b_ref:   (c, hw)  B, natural column order j = hj*w + wj (resident per batch)
    # o_ref:   (tm, hw) out[i, j] = sum_c A[c, pcol(i)] * B[c, j]
    ti = pl.program_id(1)

    # Selection matrix S[k, t] = 1  iff  inv_perm[k] == ti*tm + t  (global row i).
    i_glob = ti * tm + lax.broadcasted_iota(jnp.int32, (hw, tm), 1)
    sel = (inv_ref[...] == i_glob).astype(a_ref.dtype)

    # Column-permute A on the MXU: exact (exactly one 1.0 per column of S).
    a_perm = jnp.dot(
        a_ref[...], sel,
        preferred_element_type=jnp.float32,
        precision=precision,
    ).astype(a_ref.dtype)

    # out[i, j] = sum_c A_perm[c, i] * B[c, j]   (contract dim 0 of both).
    o_ref[...] = lax.dot_general(
        a_perm, b_ref[...],
        dimension_numbers=(((0,), (0,)), ((), ())),
        preferred_element_type=jnp.float32,
        precision=precision,
    ).astype(o_ref.dtype)


def _vmem_working_set(hw, c, tm, itemsize):
    resident_inputs = 2 * 2 * c * hw * itemsize        # A + B slabs, double-buffered
    out_bufs = 2 * tm * hw * itemsize                  # output tile, double-buffered
    inv_vec = 2 * max(hw, 8) * 128 * 4                 # (hw, 1) int32, lane-padded
    transient = (hw * tm + c * tm + tm * hw) * 4       # sel + a_perm + f32 dot result
    return resident_inputs + out_bufs + inv_vec + transient


def _choose_row_tile(hw, c, itemsize, vmem_budget=48 * 1024 * 1024):
    # Candidates: divisors of hw that are multiples of 8 (sublane granularity),
    # capped at 1024 (larger buys nothing once the output tile is lane-dense).
    cands = [t for t in range(8, min(hw, 1024) + 1, 8) if hw % t == 0]
    if not cands:
        return hw  # tiny / odd hw: one full-extent tile (block == full dims)

    def fits(t):
        return _vmem_working_set(hw, c, t, itemsize) <= vmem_budget

    # Prefer the largest tile that fits AND leaves >= 2 row tiles per batch
    # (pipeline steps / megacore-shardable work); else largest that fits.
    for t in sorted(cands, reverse=True):
        if hw // t >= 2 and fits(t):
            return t
    for t in sorted(cands, reverse=True):
        if fits(t):
            return t
    return cands[0]


def feature_correlation(feature_A, feature_B, *, out_dtype=None, precision=None):
    """Pallas implementation of FeatureCorrelation.forward (NCHW inputs)."""
    b, c, h, w = feature_A.shape
    hw = h * w
    out_dtype = feature_A.dtype if out_dtype is None else out_dtype
    itemsize = jnp.dtype(feature_A.dtype).itemsize

    tm = _choose_row_tile(hw, c, itemsize)
    n_tiles = hw // tm

    # Free reshapes only (both arrays stay in their natural HBM layout).
    a_mat = feature_A.reshape(b, c, hw)   # columns k = hi*w + wi
    b_mat = feature_B.reshape(b, c, hw)   # columns j = hj*w + wj

    # inv_perm[k] = output-row index i = wi*h + hi that consumes A column
    # k = hi*w + wi.  Tiny (hw,1) int32 array, DMA'd once and kept resident.
    k_idx = jnp.arange(hw, dtype=jnp.int32)
    inv_perm = ((k_idx % w) * h + (k_idx // w)).astype(jnp.int32).reshape(hw, 1)

    kernel = functools.partial(_corr_kernel, tm=tm, hw=hw, precision=precision)

    ws = _vmem_working_set(hw, c, tm, itemsize)
    vmem_limit = int(min(max(ws * 1.25, 32 * 1024 * 1024), 64 * 1024 * 1024))

    flops = 4 * b * c * hw * hw  # main matmul + permutation matmul (MXU is idle anyway)
    bytes_accessed = itemsize * (2 * b * c * hw) + jnp.dtype(out_dtype).itemsize * (b * hw * hw) + 4 * hw

    feature_mul = pl.pallas_call(
        kernel,
        out_shape=jax.ShapeDtypeStruct((b, hw, hw), out_dtype),
        # Grid: batch OUTER, row-tile INNER.  A/B block indices are constant
        # along the inner axis -> DMA'd once per batch and kept resident.
        grid=(b, n_tiles),
        in_specs=[
            # Inverse-permutation vector: single full block, resident forever.
            pl.BlockSpec((hw, 1), lambda bi, ti: (0, 0)),
            # Full A slab per batch (needed: permuted columns of a tile are
            # scattered over all natural columns), lane-dense (c, hw).
            pl.BlockSpec((None, c, hw), lambda bi, ti: (bi, 0, 0)),
            # Full B slab per batch, lane-dense (c, hw).
            pl.BlockSpec((None, c, hw), lambda bi, ti: (bi, 0, 0)),
        ],
        # Lane-dense output row-tile (tm, hw).
        out_specs=pl.BlockSpec((None, tm, hw), lambda bi, ti: (bi, ti, 0)),
        compiler_params=pltpu.CompilerParams(
            dimension_semantics=("parallel", "parallel"),
            vmem_limit_bytes=vmem_limit,
        ),
        cost_estimate=pl.CostEstimate(
            flops=flops, transcendentals=0, bytes_accessed=bytes_accessed,
        ),
    )(inv_perm, a_mat, b_mat)

    # feature_mul[b, i, j] with j = hj*w + wj -> correlation[b, i, hj, wj].
    # Row-major reshape: free, no data movement.
    return feature_mul.reshape(b, hw, h, w)


def _reference(feature_A, feature_B):
    # Pure-JAX reference reproducing the PyTorch ops exactly.
    b, c, h, w = feature_A.shape
    hw = h * w
    a = jnp.transpose(feature_A, (0, 1, 3, 2)).reshape(b, c, hw)
    bt = jnp.transpose(feature_B.reshape(b, c, hw), (0, 2, 1))
    mul = jnp.einsum("bjc,bci->bji", bt, a)
    return jnp.transpose(mul.reshape(b, h, w, hw), (0, 3, 1, 2))


if __name__ == "__main__":
    key = jax.random.PRNGKey(0)

    def _run_case(b, c, h, w):
        kA, kB = jax.random.split(jax.random.fold_in(key, c * 10000 + h * 100 + w))
        fa = jax.random.normal(kA, (b, c, h, w), dtype=jnp.float32)
        fb = jax.random.normal(kB, (b, c, h, w), dtype=jnp.float32)
        out = jax.block_until_ready(feature_correlation(fa, fb))
        ref = _reference(fa, fb)
        assert out.shape == (b, h * w, h, w), out.shape
        assert jnp.allclose(out, ref, atol=1e-4, rtol=1e-4), f"mismatch at {(b, c, h, w)}"

    # Small square case: hw=256 -> tm=128 (2 row tiles per batch).
    _run_case(2, 4, 16, 16)
    # CP-VTON aspect ratio: hw = 16*12 = 192 -> tm=96, masked trailing lanes,
    # non-square h != w exercises the permutation logic.
    _run_case(2, 32, 16, 12)

    print("KERNEL_OK")
</pallas_src>

<mosaic_0001>
module attributes {stable_mosaic.version = 11 : i64} {
  func.func @_corr_kernel(%arg0: i32, %arg1: i32, %arg2: memref<256x1xi32, #tpu.memory_space<vmem>>, %arg3: memref<1x4x256xf32, #tpu.memory_space<vmem>>, %arg4: memref<1x4x256xf32, #tpu.memory_space<vmem>>, %arg5: memref<1x128x256xf32, #tpu.memory_space<vmem>>) attributes {dimension_semantics = [#tpu.dimension_semantics<parallel>, #tpu.dimension_semantics<parallel>], iteration_bounds = array<i64: 2, 2>, scalar_prefetch = 0 : i64, scratch_operands = 0 : i64, tpu.core_type = #tpu.core_type<tc>, window_params = [{pipeline_mode = #tpu.pipeline_mode<synchronous>, transform_indices = @transform_0, window_bounds = array<i64: 256, 1>}, {transform_indices = @transform_1, window_bounds = array<i64: 1, 4, 256>}, {transform_indices = @transform_2, window_bounds = array<i64: 1, 4, 256>}, {transform_indices = @transform_3, window_bounds = array<i64: 1, 128, 256>}]} {
    %c128_i32 = arith.constant 128 : i32
    %0 = arith.muli %arg1, %c128_i32 : i32
    %1 = tpu.iota {dimensions = array<i32: 1>} : vector<256x128xi32>
    %2 = vector.broadcast %0 : i32 to vector<256x128xi32>
    %3 = arith.addi %2, %1 : vector<256x128xi32>
    %c0 = arith.constant 0 : index
    %c0_0 = arith.constant 0 : index
    %4 = vector.load %arg2[%c0, %c0_0] : memref<256x1xi32, #tpu.memory_space<vmem>>, vector<256x1xi32>
    %5 = vector.broadcast %4 : vector<256x1xi32> to vector<256x128xi32>
    %6 = arith.cmpi eq, %5, %3 : vector<256x128xi32>
    %7 = arith.extui %6 : vector<256x128xi1> to vector<256x128xi32>
    %8 = arith.sitofp %7 : vector<256x128xi32> to vector<256x128xf32>
    %c0_1 = arith.constant 0 : index
    %c0_2 = arith.constant 0 : index
    %c0_3 = arith.constant 0 : index
    %9 = vector.load %arg3[%c0_1, %c0_2, %c0_3] : memref<1x4x256xf32, #tpu.memory_space<vmem>>, vector<1x4x256xf32>
    %10 = vector.shape_cast %9 : vector<1x4x256xf32> to vector<4x256xf32>
    %cst = arith.constant dense<0.000000e+00> : vector<4x128xf32>
    %11 = tpu.matmul %10, %8, %cst {dimension_numbers = #tpu.dot_dimension_numbers<[1], [0], [0], [1], [0, 0, 1, 1], [], []>} : vector<4x256xf32>, vector<256x128xf32>, vector<4x128xf32> -> vector<4x128xf32>
    %c0_4 = arith.constant 0 : index
    %c0_5 = arith.constant 0 : index
    %c0_6 = arith.constant 0 : index
    %12 = vector.load %arg4[%c0_4, %c0_5, %c0_6] : memref<1x4x256xf32, #tpu.memory_space<vmem>>, vector<1x4x256xf32>
    %13 = vector.shape_cast %12 : vector<1x4x256xf32> to vector<4x256xf32>
    %cst_7 = arith.constant dense<0.000000e+00> : vector<128x256xf32>
    %14 = tpu.matmul %11, %13, %cst_7 {dimension_numbers = #tpu.dot_dimension_numbers<[0], [0], [1], [1], [0, 1, 1, 1], [], []>} : vector<4x128xf32>, vector<4x256xf32>, vector<128x256xf32> -> vector<128x256xf32>
    %c0_8 = arith.constant 0 : index
    %c0_9 = arith.constant 0 : index
    %c0_10 = arith.constant 0 : index
    %15 = vector.load %arg5[%c0_8, %c0_9, %c0_10] : memref<1x128x256xf32, #tpu.memory_space<vmem>>, vector<1x128x256xf32>
    %16 = vector.shape_cast %15 : vector<1x128x256xf32> to vector<128x256xf32>
    %17 = vector.shape_cast %14 : vector<128x256xf32> to vector<1x128x256xf32>
    tpu.vector_store %arg5[%c0_8, %c0_9, %c0_10], %17 {strides = array<i32>} : memref<1x128x256xf32, #tpu.memory_space<vmem>>, vector<1x128x256xf32>,
    return
  }
  func.func @transform_0(%arg0: i32, %arg1: i32) -> (i32, i32) {
    %c0_i32 = arith.constant 0 : i32
    %c0_i32_0 = arith.constant 0 : i32
    %c0_i32_1 = arith.constant 0 : i32
    return %c0_i32, %c0_i32_0 : i32, i32
  }
  func.func @transform_1(%arg0: i32, %arg1: i32) -> (i32, i32, i32) {
    %c0_i32 = arith.constant 0 : i32
    %c0_i32_0 = arith.constant 0 : i32
    %c0_i32_1 = arith.constant 0 : i32
    return %arg0, %c0_i32, %c0_i32_0 : i32, i32, i32
  }
  func.func @transform_2(%arg0: i32, %arg1: i32) -> (i32, i32, i32) {
    %c0_i32 = arith.constant 0 : i32
    %c0_i32_0 = arith.constant 0 : i32
    %c0_i32_1 = arith.constant 0 : i32
    return %arg0, %c0_i32, %c0_i32_0 : i32, i32, i32
  }
  func.func @transform_3(%arg0: i32, %arg1: i32) -> (i32, i32, i32) {
    %c0_i32 = arith.constant 0 : i32
    %c0_i32_0 = arith.constant 0 : i32
    return %arg0, %arg1, %c0_i32 : i32, i32, i32
  }
}

</mosaic_0001>

<bundles_post_ra>
// kernel: tpu_custom_call.1
= control target key start
LH: loop header
LB: loop body
LE: loop exit
PB: predicated region body
PF: predicated region fallthrough
CT: control target
= control target key end

     0   :  { %8 = vsyncpa [#allocation3], 0  ;;  %s1623_s0 = inlined_call_operand.vmem [shape: s32[256,1], index: 0, kind: input, shape index: {}]   ;;  %s1624_s1 = inlined_call_operand.vmem [shape: f32[2,4,256], index: 1, kind: input, shape index: {}]   ;;  %s1625_s2 = inlined_call_operand.vmem [shape: f32[2,4,256], index: 2, kind: input, shape index: {}]   ;;  %s1626_s3 = inlined_call_operand.hbm [shape: f32[2,256,256], index: 3, kind: output, shape index: {}]  }
   0x1   :  { %10 = vsyncpa [#allocation3 + $0x1], 0  ;;  %s1268_s12 = smov 0   ;;  %s1270_s13 = smov 0  }
   0x2   :  { %s1272_s14 = smov 0   ;;  %s1274_s15 = smov 0  }
   0x3   :  { %s1276_s16 = smov 0   ;;  %s1278_s17 = smov 0  }
   0x4   :  { %s1280_s18 = smov 0   ;;  %s1282_s19 = smov 0  }
   0x5 LB: > { %s894_s20 = sadd.s32 4294967295, %s1240_s19   ;;  %s895_s21 = sadd.s32 4294967294, %s1240_s19   ;;  %s1240_s19 = sphi %s1282_s19, %s16_s19   ;;  %s1236_s18 = sphi %s1280_s18, %s1635_s18   ;;  %s1232_s17 = sphi %s1278_s17, %s1634_s17   ;;  %s1228_s16 = sphi %s1276_s16, %s1633_s16   ;;  %s1224_s15 = sphi %s1274_s15, %s1632_s15   ;;  %s1220_s14 = sphi %s1272_s14, %s1631_s14   ;;  %s1216_s13 = sphi %s1270_s13, %s1630_s13   ;;  %s1212_s12 = sphi %s1268_s12, %s1629_s12  }
   0x6   : > { %s25_s22 = sadd.s32 1, %s1232_s17  ;;  %s28_s23 = sadd.s32 1, %s1236_s18 }
   0x7   : > { %p26_p0 = scmp.ge.s32.totalorder %s25_s22, 2  ;;  %p120_p1 = scmp.ne.s32.totalorder %s1220_s14, %s1216_s13 }
   0x8   : > { %p121_p2 = scmp.eq.s32.totalorder %s894_s20, 3  ;;  %p126_p5 = scmp.ne.s32.totalorder %s1216_s13, %s1212_s12 }
   0x9   : > { %s1637_s22 = smov (%p26_p0, %s25_s22), 0  ;;  %s1639_s23 = smov (!%p26_p0, %s28_s23), %s1236_s18 }
   0xa   : > { %s106_s24 = ssub.s32 %s1232_s17, %s1637_s22  ;;  %p1319_p3 = por %p121_p2, %p120_p1 }
   0xb   : > { %p30_p4 = scmp.ge.s32.totalorder %s1639_s23, 2  ;;  %p127_p6 = scmp.eq.s32.totalorder %s895_s21, 3 }
   0xc   : > { %p898_p7 = scmp.ge.s32.totalorder %s1240_s19, 1  ;;  %p164_p9 = scmp.lt.s32.totalorder %s1240_s19, 5 }
   0xd   : > { %s1641_s23 = smov (%p30_p4, %s1639_s23), 0  ;;  %p1328_p8 = por %p127_p6, %p126_p5 }
   0xe   : > { %s105_s27 = ssub.s32 %s1236_s18, %s1641_s23  ;;  %s110_s28 = sadd.s32 1, %s1220_s14 }
   0xf   : > { %s107_s29 = sor.u32 %s106_s24, %s105_s27  ;;  %p165_p10 = pnand %p898_p7, %p164_p9 }
  0x10   : > { %p108_p11 = scmp.eq.s32.totalorder %s107_s29, 0  ;;  %v225_v0 = vld [vmem:[%s1623_s0 + $0x80] sm:$0xff] (!%p165_p10)  ;;  %v1242_v2 = vmov (!%p165_p10), 0   ;;  %v226_v3 = vld [vmem:[%s1623_s0 + $0x88] sm:$0xff] (!%p165_p10)  ;;  %v227_v5 = vld [vmem:[%s1623_s0 + $0x90] sm:$0xff] (!%p165_p10)  ;;  %p193_p12 = scmp.lt.s32.totalorder (!%p165_p10), %s1228_s16, 1  ;;  %v205_v35 = vlaneseq (!%p165_p10) }
  0x11   : > { %168 = sbr.rel (%p165_p10) target bundleno = 844 (0x34c), region = 32  ;;  %v209_v1 = vld [vmem:[%s1623_s0] sm:$0xff] (!%p165_p10)  ;;  %1143 = vset.pattern.permute.xlu1 (!%p165_p10), %v1242_v2  ;;  %1142 = vset.pattern.permute.xlu0 (!%p165_p10), %v1242_v2  ;;  %v210_v4 = vld [vmem:[%s1623_s0 + $0x8] sm:$0xff] (!%p165_p10)  ;;  %v228_v6 = vld [vmem:[%s1623_s0 + $0x98] sm:$0xff] (!%p165_p10)  ;;  %s904_s29 = sshll.u32 (!%p165_p10), %s1224_s15, 7 }
  0x12   : > { %s1337_s30 = scalar_select %p108_p11, %s1220_s14, %s110_s28  }
  0x13   : > { %290 = vperm.xlu0 (!%p165_p10), %1142, %v225_v0   ;;  %242 = vperm.xlu1 (!%p165_p10), %1143, %v209_v1   ;;  %v211_v7 = vld [vmem:[%s1623_s0 + $0x10] sm:$0xff] (!%p165_p10)  ;;  %v212_v8 = vld [vmem:[%s1623_s0 + $0x18] sm:$0xff] (!%p165_p10)  ;;  %v229_v9 = vld [vmem:[%s1623_s0 + $0xa0] sm:$0xff] (!%p165_p10)  ;;  %v206_v36 = vand.u32 (!%p165_p10), 127, %v205_v35  ;;  %v207_v37 = vstv (!%p165_p10), %s904_s29  ;;  %v1243_v43 = vmov (!%p165_p10), 1.0|1.0  }
  0x14   : > { %v230_v10 = vld [vmem:[%s1623_s0 + $0xa8] sm:$0xff] (!%p165_p10)  ;;  %v213_v11 = vld [vmem:[%s1623_s0 + $0x20] sm:$0xff] (!%p165_p10)  ;;  %v231_v13 = vld [vmem:[%s1623_s0 + $0xb0] sm:$0xff] (!%p165_p10)  ;;  %s190_s7 = sand.u32 (!%p165_p10), 1, %s1216_s13   ;;  %s996_s10 = sshll.u32 (!%p165_p10), %s1224_s15, 5 }
  0x15   : > { %v214_v12 = vld [vmem:[%s1623_s0 + $0x28] sm:$0xff] (!%p165_p10)  ;;  %v232_v14 = vld [vmem:[%s1623_s0 + $0xb8] sm:$0xff] (!%p165_p10)  ;;  %v215_v15 = vld [vmem:[%s1623_s0 + $0x30] sm:$0xff] (!%p165_p10)  ;;  %v1450_v40 = vadd.s32 (!%p165_p10), %v207_v37, %v206_v36  ;;  %s899_s8 = sshll.u32 (!%p165_p10), %s190_s7, 8  ;;  %s990_s11 = sshll.u32 (!%p165_p10), %s1228_s16, 6 }
  0x16   : > { %v216_v16 = vld [vmem:[%s1623_s0 + $0x38] sm:$0xff] (!%p165_p10)  ;;  %v233_v17 = vld [vmem:[%s1623_s0 + $0xc0] sm:$0xff] (!%p165_p10)  ;;  %v234_v18 = vld [vmem:[%s1623_s0 + $0xc8] sm:$0xff] (!%p165_p10)  ;;  %s1525_s9 = scalar_lea.vmem (!%p165_p10), [#allocation2], %s899_s8  ;;  %s1245_s4 = smov (!%p165_p10), [#allocation2]  }
  0x17   : > { %293 = vperm.xlu0 (!%p165_p10), %1142, %v226_v3   ;;  %245 = vperm.xlu1 (!%p165_p10), %1143, %v210_v4   ;;  %v217_v19 = vld [vmem:[%s1623_s0 + $0x40] sm:$0xff] (!%p165_p10)  ;;  %v218_v20 = vld [vmem:[%s1623_s0 + $0x48] sm:$0xff] (!%p165_p10)  ;;  %v235_v21 = vld [vmem:[%s1623_s0 + $0xd0] sm:$0xff] (!%p165_p10)  ;;  %s806_s24 = sshll.u32 (!%p165_p10), %s1525_s9, 4  ;;  %s1150_s5 = sshll.u32 (!%p165_p10), %s1245_s4, 4  ;;  %s1565_s24 = int_to_ptr.vmem [resolvable:$true] %s806_s24  ;;  %s1151_s5 = int_to_ptr.vmem [resolvable:$false] %s1150_s5 }
  0x18   : > { %v236_v22 = vld [vmem:[%s1623_s0 + $0xd8] sm:$0xff]  ;;  %v219_v23 = vld [vmem:[%s1623_s0 + $0x50] sm:$0xff]  ;;  %v237_v25 = vld [vmem:[%s1623_s0 + $0xe0] sm:$0xff]  ;;  %s1437_s20 = scalar_select %p193_p12, %s1228_s16, 1 }
  0x19   : > { %v220_v24 = vld [vmem:[%s1623_s0 + $0x58] sm:$0xff]  ;;  %v238_v26 = vld [vmem:[%s1623_s0 + $0xe8] sm:$0xff]  ;;  %v221_v27 = vld [vmem:[%s1623_s0 + $0x60] sm:$0xff]  ;;  %s1571_s16 = scalar_lea.sflag [#allocation3], %s190_s7  ;;  %s1146_s29 = scalar_lea.vmem %s1565_s24, 4096 }
  0x1a   : > { %v222_v28 = vld [vmem:[%s1623_s0 + $0x68] sm:$0xff]  ;;  %v239_v29 = vld [vmem:[%s1623_s0 + $0xf0] sm:$0xff]  ;;  %v240_v30 = vld [vmem:[%s1623_s0 + $0xf8] sm:$0xff]  ;;  %s994_s21 = sshll.u32 %s1437_s20, 3  ;;  %s803_s20 = sadd.s32 %s996_s10, %s990_s11 }
  0x1b   : > { %296 = vperm.xlu0 %1142, %v227_v5   ;;  %299 = vperm.xlu1 %1143, %v228_v6   ;;  %v223_v31 = vld [vmem:[%s1623_s0 + $0x70] sm:$0xff]  ;;  %v224_v32 = vld [vmem:[%s1623_s0 + $0x78] sm:$0xff]  ;;  %s197_s28 = scalar_lea.vmem %s1624_s1, %s994_s21  ;;  %s202_s6 = scalar_lea.vmem %s1625_s2, %s994_s21 }
  0x1c   : > { %v1445_v33 = vld [vmem:[%s197_s28] sm:$0xff]  ;;  %s991_s21 = sshll.u32 %s803_s20, 7  ;;  %p1147_p13 = scmp.ne.s32.totalorder %s1565_s24, %s1146_s29 }
  0x1d   : > { %v435_v34 = vcombine.high %v1445_v33, %v1445_v33  ;;  %s1563_s15 = scalar_lea.hbm %s1626_s3, %s991_s21  ;;  %p1153_p2 = scmp.lt.s32.totalorder %s1565_s24, %s1151_s5 }
  0x1e   : > { %p1148_p0 = pnand %p1147_p13, %p1319_p3 }
  0x1f   : > { %248 = vperm.xlu0 %1142, %v211_v7   ;;  %251 = vperm.xlu1 %1143, %v212_v8   ;;  %v507_v8 = vld [vmem:[%s202_s6] sm:$0xff]  ;;  %s1152_s6 = scalar_lea.vmem %s1151_s5, 8192 }
  0x20   : > { %501 = vmatprep.mubr.f32.mxu0 %v435_v34  ;;  %p1149_p1 = pneg %p1148_p0  ;;  %p1154_p4 = scmp.lt.s32.totalorder %s1152_s6, %s1146_s29 }
  0x22   : > { %p1155_p5 = por %p1154_p4, %p1153_p2 }
  0x23   : > { %302 = vperm.xlu0 %1142, %v229_v9   ;;  %305 = vperm.xlu1 %1143, %v230_v10   ;;  %v541_v9 = vcombine.high %v507_v8, %v507_v8  ;;  %v1244_v10 = vmov 0.0  }
  0x24   : > { %678 = vmatprep.mubr.f32.mxu1 %v1244_v10  ;;  %p1156_p6 = pnand %p1155_p5, %p1149_p1 }
  0x27   : > { %254 = vperm.xlu0 %1142, %v213_v11   ;;  %257 = vperm.xlu1 %1143, %v214_v12  }
  0x2b   : > { %308 = vperm.xlu0 %1142, %v231_v13   ;;  %311 = vperm.xlu1 %1143, %v232_v14  }
  0x2f   : > { %260 = vperm.xlu0 %1142, %v215_v15   ;;  %263 = vperm.xlu1 %1143, %v216_v16  }
  0x33   : > { %314 = vperm.xlu0 %1142, %v233_v17   ;;  %317 = vperm.xlu1 %1143, %v234_v18  }
  0x37   : > { %266 = vperm.xlu0 %1142, %v217_v19   ;;  %269 = vperm.xlu1 %1143, %v218_v20  }
  0x3b   : > { %320 = vperm.xlu0 %1142, %v235_v21   ;;  %323 = vperm.xlu1 %1143, %v236_v22  }
  0x3f   : > { %272 = vperm.xlu0 %1142, %v219_v23   ;;  %275 = vperm.xlu1 %1143, %v220_v24  }
  0x43   : > { %326 = vperm.xlu0 %1142, %v237_v25   ;;  %329 = vperm.xlu1 %1143, %v238_v26  }
  0x47   : > { %278 = vperm.xlu0 %1142, %v221_v27   ;;  %281 = vperm.xlu1 %1143, %v222_v28  }
  0x4b   : > { %332 = vperm.xlu0 %1142, %v239_v29   ;;  %335 = vperm.xlu1 %1143, %v240_v30  }
  0x4f   : > { %284 = vperm.xlu0 %1142, %v223_v31   ;;  %287 = vperm.xlu1 %1143, %v224_v32  }
  0x92   : > { %v291_v38 = vpop.permute.xlu0 %290  ;;  %v243_v39 = vpop.permute.xlu1 %242 }
  0x93   : > { %vm337_vm0 = vcmp.eq.s32.totalorder %v243_v39, %v1450_v40  ;;  %vm353_vm3 = vcmp.eq.s32.totalorder %v291_v38, %v1450_v40 }
  0x96   : > { %v294_v41 = vpop.permute.xlu0 %293  ;;  %v246_v42 = vpop.permute.xlu1 %245 }
  0x97   : > { %vm354_vm1 = vcmp.eq.s32.totalorder %v294_v41, %v1450_v40  ;;  %vm338_vm2 = vcmp.eq.s32.totalorder %v246_v42, %v1450_v40 }
  0x98   : > { %vm1034_vm4 = vmpackc.low %vm338_vm2, %vm337_vm0 }
  0x99   : > { %vm1032_vm5 = vmpackc.low %vm354_vm1, %vm353_vm3 }
  0x9a   : > { %1033 = vmatprep.subr.msk.bf16.mxu0 %vm1032_vm5, %v1243_v43  ;;  %v297_v44 = vpop.permute.xlu0 %296  ;;  %v300_v45 = vpop.permute.xlu1 %299 }
  0x9b   : > { %vm355_vm6 = vcmp.eq.s32.totalorder %v297_v44, %v1450_v40  ;;  %vm356_vm7 = vcmp.eq.s32.totalorder %v300_v45, %v1450_v40  ;;  %1035 = vmatpush3.bf16.msk.msra.mxu0 %vm1034_vm4, %v1243_v43 }
  0x9c   : > { %vm1036_vm8 = vmpackc.low %vm356_vm7, %vm355_vm6 }
  0x9d   : > { %1037 = vmatprep.subr.msk.bf16.mxu0 %vm1036_vm8, %v1243_v43 }
  0x9e   : > { %v249_v46 = vpop.permute.xlu0 %248  ;;  %v252_v47 = vpop.permute.xlu1 %251 }
  0x9f   : > { %vm339_vm9 = vcmp.eq.s32.totalorder %v249_v46, %v1450_v40  ;;  %vm340_vm10 = vcmp.eq.s32.totalorder %v252_v47, %v1450_v40 }
  0xa0   : > { %vm1038_vm11 = vmpackc.low %vm340_vm10, %vm339_vm9 }
  0xa1   : > { %1039 = vmatpush3.bf16.msk.msra.mxu0 %vm1038_vm11, %v1243_v43 }
  0xa2   : > { %v303_v48 = vpop.permute.xlu0 %302  ;;  %v306_v49 = vpop.permute.xlu1 %305 }
  0xa3   : > { %vm357_vm12 = vcmp.eq.s32.totalorder %v303_v48, %v1450_v40  ;;  %vm358_vm13 = vcmp.eq.s32.totalorder %v306_v49, %v1450_v40 }
  0xa4   : > { %vm1040_vm14 = vmpackc.low %vm358_vm13, %vm357_vm12 }
  0xa5   : > { %1041 = vmatprep.subr.msk.bf16.mxu0 %vm1040_vm14, %v1243_v43 }
  0xa6   : > { %v255_v50 = vpop.permute.xlu0 %254  ;;  %v258_v51 = vpop.permute.xlu1 %257 }
  0xa7   : > { %vm341_vm15 = vcmp.eq.s32.totalorder %v255_v50, %v1450_v40  ;;  %vm342_vm0 = vcmp.eq.s32.totalorder %v258_v51, %v1450_v40 }
  0xa8   : > { %vm1042_vm1 = vmpackc.low %vm342_vm0, %vm341_vm15 }
  0xa9   : > { %1043 = vmatpush3.bf16.msk.msra.mxu0 %vm1042_vm1, %v1243_v43 }
  0xaa   : > { %v309_v52 = vpop.permute.xlu0 %308  ;;  %v312_v53 = vpop.permute.xlu1 %311 }
  0xab   : > { %vm359_vm2 = vcmp.eq.s32.totalorder %v309_v52, %v1450_v40  ;;  %vm360_vm3 = vcmp.eq.s32.totalorder %v312_v53, %v1450_v40 }
  0xac   : > { %vm1044_vm4 = vmpackc.low %vm360_vm3, %vm359_vm2 }
  0xad   : > { %1045 = vmatprep.subr.msk.bf16.mxu0 %vm1044_vm4, %v1243_v43 }
  0xae   : > { %v261_v54 = vpop.permute.xlu0 %260  ;;  %v264_v55 = vpop.permute.xlu1 %263 }
  0xaf   : > { %vm343_vm5 = vcmp.eq.s32.totalorder %v261_v54, %v1450_v40  ;;  %vm344_vm6 = vcmp.eq.s32.totalorder %v264_v55, %v1450_v40 }
  0xb0   : > { %vm1046_vm7 = vmpackc.low %vm344_vm6, %vm343_vm5 }
  0xb1   : > { %1047 = vmatpush3.bf16.msk.msra.mxu0 %vm1046_vm7, %v1243_v43 }
  0xb2   : > { %v315_v56 = vpop.permute.xlu0 %314  ;;  %v318_v57 = vpop.permute.xlu1 %317 }
  0xb3   : > { %vm361_vm8 = vcmp.eq.s32.totalorder %v315_v56, %v1450_v40  ;;  %vm362_vm9 = vcmp.eq.s32.totalorder %v318_v57, %v1450_v40 }
  0xb4   : > { %vm1048_vm10 = vmpackc.low %vm362_vm9, %vm361_vm8 }
  0xb5   : > { %1049 = vmatprep.subr.msk.bf16.mxu0 %vm1048_vm10, %v1243_v43 }
  0xb6   : > { %v267_v58 = vpop.permute.xlu0 %266  ;;  %v270_v59 = vpop.permute.xlu1 %269 }
  0xb7   : > { %vm345_vm11 = vcmp.eq.s32.totalorder %v267_v58, %v1450_v40  ;;  %vm346_vm12 = vcmp.eq.s32.totalorder %v270_v59, %v1450_v40 }
  0xb8   : > { %vm1050_vm13 = vmpackc.low %vm346_vm12, %vm345_vm11 }
  0xb9   : > { %1051 = vmatpush3.bf16.msk.msra.mxu0 %vm1050_vm13, %v1243_v43 }
  0xba   : > { %v321_v60 = vpop.permute.xlu0 %320  ;;  %v324_v61 = vpop.permute.xlu1 %323 }
  0xbb   : > { %vm363_vm14 = vcmp.eq.s32.totalorder %v321_v60, %v1450_v40  ;;  %vm364_vm15 = vcmp.eq.s32.totalorder %v324_v61, %v1450_v40 }
  0xbc   : > { %vm1052_vm0 = vmpackc.low %vm364_vm15, %vm363_vm14 }
  0xbd   : > { %1053 = vmatprep.subr.msk.bf16.mxu0 %vm1052_vm0, %v1243_v43  ;;  %vm591_vm0 = vcmask 1043456  }
  0xbe   : > { %v273_v62 = vpop.permute.xlu0 %272  ;;  %v276_v63 = vpop.permute.xlu1 %275  ;;  %1064 = vmatprep.subr.msk.mxu1 %vm591_vm0, %v541_v9 }
  0xbf   : > { %vm347_vm1 = vcmp.eq.s32.totalorder %v273_v62, %v1450_v40  ;;  %vm348_vm2 = vcmp.eq.s32.totalorder %v276_v63, %v1450_v40  ;;  %1065 = vmatpush1.msk.msra.mxu1 %vm591_vm0, %v507_v8 }
  0xc0   : > { %vm1054_vm3 = vmpackc.low %vm348_vm2, %vm347_vm1  ;;  %vm542_vm1 = vcmask 31744  }
  0xc1   : > { %1055 = vmatpush3.bf16.msk.msra.mxu0 %vm1054_vm3, %v1243_v43 }
  0xc2   : > { %v327_v0 = vpop.permute.xlu0 %326  ;;  %v330_v1 = vpop.permute.xlu1 %329 }
  0xc3   : > { %vm365_vm4 = vcmp.eq.s32.totalorder %v327_v0, %v1450_v40  ;;  %vm366_vm5 = vcmp.eq.s32.totalorder %v330_v1, %v1450_v40 }
  0xc4   : > { %vm1056_vm6 = vmpackc.low %vm366_vm5, %vm365_vm4 }
  0xc5   : > { %1057 = vmatprep.subr.msk.bf16.mxu0 %vm1056_vm6, %v1243_v43 }
  0xc6   : > { %v279_v2 = vpop.permute.xlu0 %278  ;;  %v282_v3 = vpop.permute.xlu1 %281 }
  0xc7   : > { %vm349_vm7 = vcmp.eq.s32.totalorder %v279_v2, %v1450_v40  ;;  %vm350_vm8 = vcmp.eq.s32.totalorder %v282_v3, %v1450_v40 }
  0xc8   : > { %vm1058_vm9 = vmpackc.low %vm350_vm8, %vm349_vm7 }
  0xc9   : > { %1059 = vmatpush3.bf16.msk.msra.mxu0 %vm1058_vm9, %v1243_v43 }
  0xca   : > { %v333_v4 = vpop.permute.xlu0 %332  ;;  %v336_v5 = vpop.permute.xlu1 %335 }
  0xcb   : > { %vm367_vm10 = vcmp.eq.s32.totalorder %v333_v4, %v1450_v40  ;;  %vm368_vm11 = vcmp.eq.s32.totalorder %v336_v5, %v1450_v40 }
  0xcc   : > { %vm1060_vm12 = vmpackc.low %vm368_vm11, %vm367_vm10 }
  0xcd   : > { %1061 = vmatprep.subr.msk.bf16.mxu0 %vm1060_vm12, %v1243_v43 }
  0xce   : > { %v285_v6 = vpop.permute.xlu0 %284  ;;  %v288_v7 = vpop.permute.xlu1 %287 }
  0xcf   : > { %vm351_vm13 = vcmp.eq.s32.totalorder %v285_v6, %v1450_v40  ;;  %vm352_vm14 = vcmp.eq.s32.totalorder %v288_v7, %v1450_v40 }
  0xd0   : > { %vm1062_vm15 = vmpackc.low %vm352_vm14, %vm351_vm13 }
  0xd1   : > { %1063 = vmatpush3.bf16.msk.msra.mxu0 %vm1062_vm15, %v1243_v43 }
  0xd2   : > { %969 = vmatprep.subr.msk.mxu0 %vm591_vm0, %v541_v9 }
  0xd4   : > { %502 = vmatmul.mubr.f32.vlgmr.msra.gmra.mrb[0].mxu0 %v1445_v33 }
  0xd5   : > { %660 = vmatprep.mubr.f32.mxu0 %v1244_v10  ;;  %970 = vmatpush1.msk.msra.mxu0 %vm591_vm0, %v507_v8 }
 0x1a7   : > { %v1029_v11 = vpop.f32.mrb[0].mxu0 }
 0x1a8   : > { %v1030_v12 = vpop.f32.mrb[1].mxu0 }
 0x1a9   : > { %v1031_v13 = vadd.f32 %v1030_v12, %v1029_v11 }
 0x1ab   : > { %508 = vxpose.xlu0.b32.start.end [1/1] (short) %v1031_v13, 128 }
 0x22b   : > { %v524_v14 = vpop.trf.xlu0 }
 0x22c   : > { %971 = vmatmul.mubr.msk.f32.vlgmr.msra.gmra.mrb[2].mxu0 %vm542_vm1, %v524_v14 }
 0x22d   : > { %666 = vmatprep.mubr.f32.mxu0 %v1244_v10 }
 0x22f   : > { %v525_v15 = vpop.trf.xlu0 }
 0x230   : > { %972 = vmatmul.mubr.msk.f32.gmra.mrb[4].mxu0 %vm542_vm1, %v525_v15 }
 0x231   : > { %672 = vmatprep.mubr.f32.mxu0 %v1244_v10 }
 0x233   : > { %v526_v16 = vpop.trf.xlu0 }
 0x234   : > { %973 = vmatmul.mubr.msk.f32.gmra.mrb[6].mxu0 %vm542_vm1, %v526_v16 }
 0x237   : > { %v527_v17 = vpop.trf.xlu0 }
 0x238   : > { %974 = vmatmul.mubr.msk.f32.vlgmr.msra.gmra.mrb[0].mxu1 %vm542_vm1, %v527_v17 }
 0x239   : > { %684 = vmatprep.mubr.f32.mxu1 %v1244_v10 }
 0x23b   : > { %v528_v18 = vpop.trf.xlu0 }
 0x23c   : > { %975 = vmatmul.mubr.msk.f32.gmra.mrb[2].mxu1 %vm542_vm1, %v528_v18 }
 0x23d   : > { %690 = vmatprep.mubr.f32.mxu1 %v1244_v10 }
 0x23f   : > { %v529_v19 = vpop.trf.xlu0 }
 0x240   : > { %976 = vmatmul.mubr.msk.f32.gmra.mrb[4].mxu1 %vm542_vm1, %v529_v19 }
 0x241   : > { %696 = vmatprep.mubr.f32.mxu1 %v1244_v10 }
 0x243   : > { %v530_v20 = vpop.trf.xlu0 }
 0x244   : > { %977 = vmatmul.mubr.msk.f32.gmra.mrb[6].mxu1 %vm542_vm1, %v530_v20 }
 0x245   : > { %702 = vmatprep.mubr.f32.mxu1 %v1244_v10 }
 0x247   : > { %v531_v21 = vpop.trf.xlu0 }
 0x248   : > { %978 = vmatmul.mubr.msk.f32.gmra.mrb[8].mxu1 %vm542_vm1, %v531_v21 }
 0x249   : > { %708 = vmatprep.mubr.f32.mxu1 %v1244_v10 }
 0x24b   : > { %v532_v22 = vpop.trf.xlu0 }
 0x24c   : > { %979 = vmatmul.mubr.msk.f32.gmra.mrb[10].mxu1 %vm542_vm1, %v532_v22 }
 0x24d   : > { %714 = vmatprep.mubr.f32.mxu1 %v1244_v10 }
 0x24f   : > { %v533_v23 = vpop.trf.xlu0 }
 0x250   : > { %980 = vmatmul.mubr.msk.f32.gmra.mrb[12].mxu1 %vm542_vm1, %v533_v23 }
 0x251   : > { %720 = vmatprep.mubr.f32.mxu1 %v1244_v10 }
 0x253   : > { %v534_v24 = vpop.trf.xlu0 }
 0x254   : > { %981 = vmatmul.mubr.msk.f32.gmra.mrb[14].mxu1 %vm542_vm1, %v534_v24 }
 0x255   : > { %726 = vmatprep.mubr.f32.mxu1 %v1244_v10 }
 0x257   : > { %v535_v25 = vpop.trf.xlu0 }
 0x258   : > { %982 = vmatmul.mubr.msk.f32.gmra.mrb[16].mxu1 %vm542_vm1, %v535_v25 }
 0x259   : > { %732 = vmatprep.mubr.f32.mxu1 %v1244_v10 }
 0x25b   : > { %v536_v26 = vpop.trf.xlu0 }
 0x25c   : > { %983 = vmatmul.mubr.msk.f32.gmra.mrb[18].mxu1 %vm542_vm1, %v536_v26 }
 0x25d   : > { %738 = vmatprep.mubr.f32.mxu1 %v1244_v10 }
 0x25f   : > { %v537_v27 = vpop.trf.xlu0 }
 0x260   : > { %984 = vmatmul.mubr.msk.f32.gmra.mrb[20].mxu1 %vm542_vm1, %v537_v27 }
 0x261   : > { %744 = vmatprep.mubr.f32.mxu1 %v1244_v10 }
 0x263   : > { %v538_v28 = vpop.trf.xlu0 }
 0x264   : > { %985 = vmatmul.mubr.msk.f32.gmra.mrb[22].mxu1 %vm542_vm1, %v538_v28 }
 0x265   : > { %750 = vmatprep.mubr.f32.mxu1 %v1244_v10 }
 0x267   : > { %v539_v29 = vpop.trf.xlu0 }
 0x268   : > { %986 = vmatmul.mubr.msk.f32.gmra.mrb[24].mxu1 %vm542_vm1, %v539_v29 }
 0x2ff   : > { %v662_v30 = vpop.f32.mrb[2].mxu0 }
 0x300   : > { %757 = vst [vmem:[%s1525_s9] sm:$0xff] %v662_v30  ;;  %v664_v31 = vpop.f32.mrb[3].mxu0 }
 0x301   : > { %758 = vst [vmem:[%s1525_s9 + $0x8] sm:$0xff] %v664_v31 }
 0x303   : > { %v668_v32 = vpop.f32.mrb[4].mxu0 }
 0x304   : > { %759 = vst [vmem:[%s1525_s9 + $0x10] sm:$0xff] %v668_v32  ;;  %v670_v33 = vpop.f32.mrb[5].mxu0 }
 0x305   : > { %760 = vst [vmem:[%s1525_s9 + $0x18] sm:$0xff] %v670_v33 }
 0x307   : > { %v674_v34 = vpop.f32.mrb[6].mxu0 }
 0x308   : > { %761 = vst [vmem:[%s1525_s9 + $0x20] sm:$0xff] %v674_v34  ;;  %v676_v35 = vpop.f32.mrb[7].mxu0 }
 0x309   : > { %762 = vst [vmem:[%s1525_s9 + $0x28] sm:$0xff] %v676_v35 }
 0x30b   : > { %v680_v36 = vpop.f32.mrb[0].mxu1 }
 0x30c   : > { %763 = vst [vmem:[%s1525_s9 + $0x30] sm:$0xff] %v680_v36  ;;  %v682_v37 = vpop.f32.mrb[1].mxu1 }
 0x30d   : > { %764 = vst [vmem:[%s1525_s9 + $0x38] sm:$0xff] %v682_v37 }
 0x30f   : > { %v686_v38 = vpop.f32.mrb[2].mxu1 }
 0x310   : > { %765 = vst [vmem:[%s1525_s9 + $0x40] sm:$0xff] %v686_v38  ;;  %v688_v39 = vpop.f32.mrb[3].mxu1 }
 0x311   : > { %766 = vst [vmem:[%s1525_s9 + $0x48] sm:$0xff] %v688_v39 }
 0x313   : > { %v692_v40 = vpop.f32.mrb[4].mxu1 }
 0x314   : > { %767 = vst [vmem:[%s1525_s9 + $0x50] sm:$0xff] %v692_v40  ;;  %v694_v41 = vpop.f32.mrb[5].mxu1 }
 0x315   : > { %768 = vst [vmem:[%s1525_s9 + $0x58] sm:$0xff] %v694_v41 }
 0x317   : > { %v698_v42 = vpop.f32.mrb[6].mxu1 }
 0x318   : > { %769 = vst [vmem:[%s1525_s9 + $0x60] sm:$0xff] %v698_v42  ;;  %v700_v43 = vpop.f32.mrb[7].mxu1 }
 0x319   : > { %770 = vst [vmem:[%s1525_s9 + $0x68] sm:$0xff] %v700_v43 }
 0x31b   : > { %v704_v44 = vpop.f32.mrb[8].mxu1 }
 0x31c   : > { %771 = vst [vmem:[%s1525_s9 + $0x70] sm:$0xff] %v704_v44  ;;  %v706_v45 = vpop.f32.mrb[9].mxu1 }
 0x31d   : > { %772 = vst [vmem:[%s1525_s9 + $0x78] sm:$0xff] %v706_v45 }
 0x31f   : > { %v710_v46 = vpop.f32.mrb[10].mxu1 }
 0x320   : > { %773 = vst [vmem:[%s1525_s9 + $0x80] sm:$0xff] %v710_v46  ;;  %v712_v47 = vpop.f32.mrb[11].mxu1 }
 0x321   : > { %774 = vst [vmem:[%s1525_s9 + $0x88] sm:$0xff] %v712_v47 }
 0x323   : > { %v716_v48 = vpop.f32.mrb[12].mxu1 }
 0x324   : > { %775 = vst [vmem:[%s1525_s9 + $0x90] sm:$0xff] %v716_v48  ;;  %v718_v49 = vpop.f32.mrb[13].mxu1 }
 0x325   : > { %776 = vst [vmem:[%s1525_s9 + $0x98] sm:$0xff] %v718_v49 }
 0x327   : > { %v722_v50 = vpop.f32.mrb[14].mxu1 }
 0x328   : > { %777 = vst [vmem:[%s1525_s9 + $0xa0] sm:$0xff] %v722_v50  ;;  %v724_v51 = vpop.f32.mrb[15].mxu1 }
 0x329   : > { %778 = vst [vmem:[%s1525_s9 + $0xa8] sm:$0xff] %v724_v51 }
 0x32b   : > { %v728_v52 = vpop.f32.mrb[16].mxu1 }
 0x32c   : > { %779 = vst [vmem:[%s1525_s9 + $0xb0] sm:$0xff] %v728_v52  ;;  %v730_v53 = vpop.f32.mrb[17].mxu1 }
 0x32d   : > { %780 = vst [vmem:[%s1525_s9 + $0xb8] sm:$0xff] %v730_v53 }
 0x32f   : > { %v734_v54 = vpop.f32.mrb[18].mxu1 }
 0x330   : > { %781 = vst [vmem:[%s1525_s9 + $0xc0] sm:$0xff] %v734_v54  ;;  %v736_v55 = vpop.f32.mrb[19].mxu1 }
 0x331   : > { %782 = vst [vmem:[%s1525_s9 + $0xc8] sm:$0xff] %v736_v55 }
 0x333   : > { %v740_v56 = vpop.f32.mrb[20].mxu1 }
 0x334   : > { %783 = vst [vmem:[%s1525_s9 + $0xd0] sm:$0xff] %v740_v56  ;;  %v742_v57 = vpop.f32.mrb[21].mxu1 }
 0x335   : > { %784 = vst [vmem:[%s1525_s9 + $0xd8] sm:$0xff] %v742_v57 }
 0x337   : > { %v746_v58 = vpop.f32.mrb[22].mxu1 }
 0x338   : > { %785 = vst [vmem:[%s1525_s9 + $0xe0] sm:$0xff] %v746_v58  ;;  %v748_v59 = vpop.f32.mrb[23].mxu1 }
 0x339   : > { %786 = vst [vmem:[%s1525_s9 + $0xe8] sm:$0xff] %v748_v59 }
 0x33b   : > { %v752_v60 = vpop.f32.mrb[24].mxu1 }
 0x33c   : > { %787 = vst [vmem:[%s1525_s9 + $0xf0] sm:$0xff] %v752_v60  ;;  %v754_v61 = vpop.f32.mrb[25].mxu1 }
 0x33d   : > { %788 = vst [vmem:[%s1525_s9 + $0xf8] sm:$0xff] %v754_v61 }
 0x33e   : > { %1159 = shalt.err (!%p1156_p6)
}
 0x33f   : > { %s1160_s7 = scalar_lea.hbm %s1563_s15, 4096  ;;  %s1164_s10 = scalar_lea.hbm %s1626_s3, 16384 }
 0x340   : > { %p1161_p7 = scmp.ne.s32.totalorder %s1563_s15, %s1160_s7  ;;  %p1165_p11 = scmp.lt.u32.totalorder %s1563_s15, %s1626_s3 }
 0x341   : > { %p1166_p12 = scmp.lt.u32.totalorder %s1164_s10, %s1160_s7  ;;  %p1168_p0 = scmp.lt.u32.totalorder %s1160_s7, %s1563_s15 }
 0x342   : > { %p1162_p9 = pnand %p1161_p7, %p1319_p3 }
 0x343   : > { %p1167_p13 = por %p1166_p12, %p1165_p11 }
 0x344   : > { %p1163_p10 = pneg %p1162_p9 }
 0x345   : > { %p1169_p1 = por %p1168_p0, %p1167_p13 }
 0x347   : > { %p1170_p2 = pnand %p1169_p1, %p1163_p10 }
 0x349   : > { %1173 = shalt.err (!%p1170_p2)
}
 0x34a   : > { %s1246_s21 = smov 256   ;;  %s1247_s27 = smov 16  }
 0x34b   : > { %1066 = dma.vmem_to_hbm [thread:$0]  (%p1319_p3), %s1565_s24, 4096, %s1563_s15, %s1571_s16, %s1246_s21, %s1246_s21, %s1247_s27  }
 0x34c PF: > { %p1072_p4 = scmp.ge.s32.totalorder %s1240_s19, 2  ;;  %s821_s28 = sand.u32 1, %s1212_s12  }
 0x34d   : > { %s822_s29 = scalar_lea.sflag [#allocation3], %s821_s28 }
 0x34e   : > { %p1069_p5 = pnand %p1072_p4, %p1328_p8 }
 0x350   : > { %1207 = dma.done.wait (!%p1069_p5), %s822_s29, 4096  }
 0x351   : > { %1209 = vsyncadd (!%p1069_p5), %s822_s29, 4294963200  ;;  %s16_s19 = sadd.s32 1, %s1240_s19   ;;  %s1629_s12 = smov %s1216_s13 }
 0x352   : > { %p13_p6 = scmp.ge.s32.totalorder %s16_s19, 6   ;;  %s1630_s13 = smov %s1220_s14 }
 0x353   : > { %s1631_s14 = smov %s1337_s30  ;;  %s1632_s15 = smov %s1232_s17 }
 0x354   : > { %s1633_s16 = smov %s1236_s18  ;;  %s1634_s17 = smov %s1637_s22 }
 0x355   : > { %s1635_s18 = smov %s1641_s23  ;;  %15 = sbr.rel (!%p13_p6) target bundleno = 5 (0x5), region = 70 }
 0x35c   :  { %827 = vsyncpa [#allocation3], 1 }
 0x35d   :  { %829 = vsyncpa [#allocation3 + $0x1], 1 }

</bundles_post_ra>
